<compile_context>
chip_gen: v7x
topology: tpu7x:2x2x1
jax: 0.10.0
libtpu: 0.0.40
codegen_flags: <defaults>
</compile_context>

<pallas_src>
import jax
import jax.numpy as jnp
from jax.experimental import pallas as pl
from jax.experimental.pallas import tpu as pltpu


# ---------------------------------------------------------------------------
# Kernel: one grid step = one (batch, d-tile, h-tile) cell.
#   x_ref: (td, th, W, Cin)            input tile (original dtype, cast in-kernel)
#   w_ref: (Cin, k^3*Cout)             full reshaped weight, bf16, constant block
#   b_ref: (1, k^3*Cout)               bias tiled over (kd, kh, kw), f32
#   o_ref: (td, k, th, k, W, k*Cout)   factorized upsampled output block
# ---------------------------------------------------------------------------
def _make_deconv_kernel(k, ncols):
    def kernel(x_ref, w_ref, b_ref, o_ref):
        td, _, th, _, wd, _ = o_ref.shape
        cin = x_ref.shape[-1]
        m = td * th * wd

        # Cast activations in-kernel (avoids a wrapper-side HBM round trip over x).
        a = x_ref[...].reshape(m, cin).astype(w_ref.dtype)
        # Single MXU matmul over all k^3*Cout output columns, f32 accumulation.
        acc = jnp.dot(a, w_ref[...], preferred_element_type=jnp.float32)
        acc = acc + b_ref[...]  # f32 epilogue (safe on v5e: no bf16 VPU needed)

        # Store k*k lane-aligned column slices into the factorized layout.
        # (reshape (m, ncols) -> (td, th, wd, ncols) is layout-free when W % 8 == 0;
        #  for other W it is still correct, just pays a relayout copy.)
        for kd in range(k):
            for kh in range(k):
                col = (kd * k + kh) * ncols
                o_ref[:, kd, :, kh, :, :] = (
                    acc[:, col:col + ncols]
                    .reshape(td, th, wd, ncols)
                    .astype(o_ref.dtype)
                )

    return kernel


# ---------------------------------------------------------------------------
# VMEM budgeting.
# ---------------------------------------------------------------------------
def _vmem_budget_and_limit():
    cap = 0
    try:
        info = pltpu.get_tpu_info()
        cap = int(getattr(info, "vmem_capacity_bytes", 0) or 0)
    except Exception:
        cap = 0
    if cap <= 0:
        cap = 64 * 1024 * 1024  # conservative default (v7x per-TC VMEM)
    budget = min(24 * 1024 * 1024, cap // 4)   # 24 MiB on v5e/v6e, 16 MiB on v7x
    limit = min(64 * 1024 * 1024, cap // 2)    # 64 MiB on v5e/v6e, 32 MiB on v7x
    return budget, limit


def _choose_tiles(n, d, h, wd, cin, k, cout, x_itemsize, out_itemsize, budget_bytes):
    """Pick (td, th): td divides D (with th == H), or td == 1 and th divides H."""
    k3cout = k * k * k * cout
    fixed = 2 * cin * k3cout * 2 + 2 * k3cout * 4  # resident weight (bf16, dbl-buf) + bias

    def step_bytes(m):
        return (fixed
                + 2 * m * cin * x_itemsize       # double-buffered input block
                + 2 * m * k3cout * out_itemsize  # double-buffered output block
                + m * k3cout * 4)                # in-kernel f32 accumulator

    td, th = 1, 1
    for t in sorted((t for t in range(1, d + 1) if d % t == 0), reverse=True):
        if step_bytes(t * h * wd) <= budget_bytes:
            td, th = t, h
            break
    else:
        for t in sorted((t for t in range(1, h + 1) if h % t == 0), reverse=True):
            if step_bytes(t * wd) <= budget_bytes:
                td, th = 1, t
                break
        else:
            td, th = 1, 1  # smallest possible; final check below catches true overflow

    # v7x has 2 TensorCores: make sure there are >= 2 parallel work items.
    if n * (d // td) * (h // th) < 2:
        if d > 1:
            td = max(t for t in range(1, d) if d % t == 0)
        elif h > 1 and th == h:
            th = max(t for t in range(1, h) if h % t == 0)

    assert step_bytes(td * th * wd) <= 2 * budget_bytes, (
        "Upsample kernel: even the smallest tile exceeds the VMEM budget; "
        "shape too large for this tiling scheme.")
    return td, th


# ---------------------------------------------------------------------------
# Forward: ConvTranspose3d with kernel_size == stride (non-overlapping), NDHWC in/out.
# ---------------------------------------------------------------------------
def upsample_forward(x, w, b, kernel, stride,
                     compute_dtype=jnp.bfloat16, out_dtype=jnp.bfloat16):
    """x: (N, D, H, W, Cin)   w: (Cin, Cout, k, k, k) (PyTorch layout)   b: (Cout,)
    returns (N, k*D, k*H, k*W, Cout) in out_dtype."""
    if isinstance(kernel, (tuple, list)):
        assert len(set(kernel)) == 1
        kernel = kernel[0]
    if isinstance(stride, (tuple, list)):
        assert len(set(stride)) == 1
        stride = stride[0]
    # TODO(synk): overlapping transposed conv (kernel != stride) is not implemented; the
    # backbone only uses kernel=2, stride=2.
    assert kernel == stride, "only the non-overlapping kernel == stride case is supported"
    k = int(kernel)

    n, d, h, wd, cin = x.shape
    assert w.shape[0] == cin and w.shape[2:] == (k, k, k)
    cout = w.shape[1]
    ncols = k * cout            # output last dim: (kw, cout) -> lane-dense when k*Cout % 128 == 0
    k3cout = k * k * k * cout   # all sub-positions fused into one matmul's columns
    # TODO(synk): if k*Cout is not a multiple of 128, fold kh into the stored column dim (or
    # pad Cout) to keep stores lane-dense; correct but slower as written for such shapes.

    # Weight -> (Cin, kd*kh*kw*Cout); bias tiled to match the (kd, kh, kw, cout) column order.
    wr = jnp.transpose(w, (0, 2, 3, 4, 1)).reshape(cin, k3cout).astype(compute_dtype)
    bias = jnp.tile(b, k * k * k).reshape(1, k3cout).astype(jnp.float32)

    budget, vmem_limit = _vmem_budget_and_limit()
    td, th = _choose_tiles(n, d, h, wd, cin, k, cout,
                           x_itemsize=x.dtype.itemsize,
                           out_itemsize=jnp.dtype(out_dtype).itemsize,
                           budget_bytes=budget)
    grid = (n, d // td, h // th)

    out7 = pl.pallas_call(
        _make_deconv_kernel(k, ncols),
        out_shape=jax.ShapeDtypeStruct((n, d, k, h, k, wd, ncols), out_dtype),
        grid=grid,
        in_specs=[
            # Activation tile; last two block dims equal the full array dims -> always legal.
            pl.BlockSpec((None, td, th, wd, cin), lambda ni, di, hi: (ni, di, hi, 0, 0)),
            # Full reshaped weight, constant index -> DMA'd once, reused every step.
            pl.BlockSpec((cin, k3cout), lambda ni, di, hi: (0, 0)),
            # Bias (constant block).
            pl.BlockSpec((1, k3cout), lambda ni, di, hi: (0, 0)),
        ],
        # Write straight into the factorized upsampled layout; no HBM transpose afterwards.
        out_specs=pl.BlockSpec(
            (None, td, k, th, k, wd, ncols),
            lambda ni, di, hi: (ni, di, 0, hi, 0, 0, 0),
        ),
        compiler_params=pltpu.CompilerParams(
            dimension_semantics=("parallel", "parallel", "parallel"),
            vmem_limit_bytes=vmem_limit,
        ),
    )(x, wr, bias)

    # (N, D, kd, H, kh, W, kw*Cout) -> (N, k*D, k*H, k*W, Cout): pure reshape, no data movement.
    return out7.reshape(n, d * k, h * k, wd * k, cout)


# ---------------------------------------------------------------------------
# Pure-JAX reference (f32) for a correctness check.
# ---------------------------------------------------------------------------
def _reference(x, w, b, k):
    n, d, h, wd, cin = x.shape
    cout = w.shape[1]
    y = jnp.einsum("ndhwc,coijl->ndihjwlo", x, w)          # (N,D,kd,H,kh,W,kw,Cout)
    y = y.reshape(n, d * k, h * k, wd * k, cout)
    return y + b.reshape(1, 1, 1, 1, cout)


# ---------------------------------------------------------------------------
if __name__ == "__main__":
    key = jax.random.PRNGKey(0)
    kx, kw, kb = jax.random.split(key, 3)

    # Upsample(input_dim=64, output_dim=64, kernel=2, stride=2), as used in the backbone.
    input_dim, output_dim, kernel, stride = 64, 64, 2, 2
    N, D, H, W = 2, 4, 8, 8

    x = jax.random.normal(kx, (N, D, H, W, input_dim), jnp.float32)
    w = jax.random.normal(kw, (input_dim, output_dim, kernel, kernel, kernel),
                          jnp.float32) / jnp.sqrt(8.0 * input_dim)
    b = 0.01 * jax.random.normal(kb, (output_dim,), jnp.float32)

    fwd = jax.jit(upsample_forward, static_argnames=("kernel", "stride"))
    out = fwd(x, w, b, kernel=kernel, stride=stride)
    jax.block_until_ready(out)

    assert out.shape == (N, D * stride, H * stride, W * stride, output_dim)
    assert bool(jnp.all(jnp.isfinite(out.astype(jnp.float32))))

    ref = _reference(x, w, b, kernel)
    max_err = float(jnp.max(jnp.abs(out.astype(jnp.float32) - ref)))
    assert max_err < 5e-2, f"max abs err vs reference: {max_err}"

    print("KERNEL_OK")
</pallas_src>

<mosaic_0001>
module attributes {stable_mosaic.version = 11 : i64} {
  func.func @kernel(%arg0: i32, %arg1: i32, %arg2: i32, %arg3: memref<1x4x8x8x64xf32, #tpu.memory_space<vmem>>, %arg4: memref<64x512xbf16, #tpu.memory_space<vmem>>, %arg5: memref<1x512xf32, #tpu.memory_space<vmem>>, %arg6: memref<1x4x2x8x2x8x128xbf16, #tpu.memory_space<vmem>>) attributes {dimension_semantics = [#tpu.dimension_semantics<parallel>, #tpu.dimension_semantics<parallel>, #tpu.dimension_semantics<parallel>], iteration_bounds = array<i64: 2, 1, 1>, scalar_prefetch = 0 : i64, scratch_operands = 0 : i64, tpu.core_type = #tpu.core_type<tc>, window_params = [{transform_indices = @transform_0, window_bounds = array<i64: 1, 4, 8, 8, 64>}, {pipeline_mode = #tpu.pipeline_mode<synchronous>, transform_indices = @transform_1, window_bounds = array<i64: 64, 512>}, {pipeline_mode = #tpu.pipeline_mode<synchronous>, transform_indices = @transform_2, window_bounds = array<i64: 1, 512>}, {transform_indices = @transform_3, window_bounds = array<i64: 1, 4, 2, 8, 2, 8, 128>}]} {
    %c0 = arith.constant 0 : index
    %c0_0 = arith.constant 0 : index
    %c0_1 = arith.constant 0 : index
    %c0_2 = arith.constant 0 : index
    %c0_3 = arith.constant 0 : index
    %0 = vector.load %arg3[%c0, %c0_0, %c0_1, %c0_2, %c0_3] : memref<1x4x8x8x64xf32, #tpu.memory_space<vmem>>, vector<1x4x8x8x64xf32>
    %1 = vector.shape_cast %0 : vector<1x4x8x8x64xf32> to vector<4x8x8x64xf32>
    %2 = vector.shape_cast %1 : vector<4x8x8x64xf32> to vector<256x64xf32>
    %3 = arith.truncf %2 : vector<256x64xf32> to vector<256x64xbf16>
    %c0_4 = arith.constant 0 : index
    %c0_5 = arith.constant 0 : index
    %4 = vector.load %arg4[%c0_4, %c0_5] : memref<64x512xbf16, #tpu.memory_space<vmem>>, vector<64x512xbf16>
    %cst = arith.constant dense<0.000000e+00> : vector<256x512xf32>
    %5 = tpu.matmul %3, %4, %cst {dimension_numbers = #tpu.dot_dimension_numbers<[1], [0], [0], [1], [0, 0, 1, 1], [], []>} : vector<256x64xbf16>, vector<64x512xbf16>, vector<256x512xf32> -> vector<256x512xf32>
    %c0_6 = arith.constant 0 : index
    %c0_7 = arith.constant 0 : index
    %6 = vector.load %arg5[%c0_6, %c0_7] : memref<1x512xf32, #tpu.memory_space<vmem>>, vector<1x512xf32>
    %7 = vector.broadcast %6 : vector<1x512xf32> to vector<256x512xf32>
    %8 = arith.addf %5, %7 : vector<256x512xf32>
    %9 = vector.extract_strided_slice %8 {offsets = [0, 0], sizes = [256, 128], strides = [1, 1]} : vector<256x512xf32> to vector<256x128xf32>
    %10 = vector.shape_cast %9 : vector<256x128xf32> to vector<4x8x8x128xf32>
    %11 = arith.truncf %10 : vector<4x8x8x128xf32> to vector<4x8x8x128xbf16>
    %c0_8 = arith.constant 0 : index
    %c0_9 = arith.constant 0 : index
    %c0_10 = arith.constant 0 : index
    %c0_11 = arith.constant 0 : index
    %c0_12 = arith.constant 0 : index
    %c0_13 = arith.constant 0 : index
    %c0_14 = arith.constant 0 : index
    %12 = vector.load %arg6[%c0_8, %c0_9, %c0_10, %c0_11, %c0_12, %c0_13, %c0_14] : memref<1x4x2x8x2x8x128xbf16, #tpu.memory_space<vmem>>, vector<1x4x1x8x1x8x128xbf16>
    %13 = vector.shape_cast %12 : vector<1x4x1x8x1x8x128xbf16> to vector<4x8x8x128xbf16>
    %14 = vector.shape_cast %11 : vector<4x8x8x128xbf16> to vector<1x4x1x8x1x8x128xbf16>
    tpu.vector_store %arg6[%c0_8, %c0_9, %c0_10, %c0_11, %c0_12, %c0_13, %c0_14], %14 {strides = array<i32>} : memref<1x4x2x8x2x8x128xbf16, #tpu.memory_space<vmem>>, vector<1x4x1x8x1x8x128xbf16>,
    %15 = vector.extract_strided_slice %8 {offsets = [0, 128], sizes = [256, 128], strides = [1, 1]} : vector<256x512xf32> to vector<256x128xf32>
    %16 = vector.shape_cast %15 : vector<256x128xf32> to vector<4x8x8x128xf32>
    %17 = arith.truncf %16 : vector<4x8x8x128xf32> to vector<4x8x8x128xbf16>
    %c0_15 = arith.constant 0 : index
    %c0_16 = arith.constant 0 : index
    %c0_17 = arith.constant 0 : index
    %c0_18 = arith.constant 0 : index
    %c1 = arith.constant 1 : index
    %c0_19 = arith.constant 0 : index
    %c0_20 = arith.constant 0 : index
    %18 = vector.load %arg6[%c0_15, %c0_16, %c0_17, %c0_18, %c1, %c0_19, %c0_20] : memref<1x4x2x8x2x8x128xbf16, #tpu.memory_space<vmem>>, vector<1x4x1x8x1x8x128xbf16>
    %19 = vector.shape_cast %18 : vector<1x4x1x8x1x8x128xbf16> to vector<4x8x8x128xbf16>
    %20 = vector.shape_cast %17 : vector<4x8x8x128xbf16> to vector<1x4x1x8x1x8x128xbf16>
    tpu.vector_store %arg6[%c0_15, %c0_16, %c0_17, %c0_18, %c1, %c0_19, %c0_20], %20 {strides = array<i32>} : memref<1x4x2x8x2x8x128xbf16, #tpu.memory_space<vmem>>, vector<1x4x1x8x1x8x128xbf16>,
    %21 = vector.extract_strided_slice %8 {offsets = [0, 256], sizes = [256, 128], strides = [1, 1]} : vector<256x512xf32> to vector<256x128xf32>
    %22 = vector.shape_cast %21 : vector<256x128xf32> to vector<4x8x8x128xf32>
    %23 = arith.truncf %22 : vector<4x8x8x128xf32> to vector<4x8x8x128xbf16>
    %c0_21 = arith.constant 0 : index
    %c0_22 = arith.constant 0 : index
    %c1_23 = arith.constant 1 : index
    %c0_24 = arith.constant 0 : index
    %c0_25 = arith.constant 0 : index
    %c0_26 = arith.constant 0 : index
    %c0_27 = arith.constant 0 : index
    %24 = vector.load %arg6[%c0_21, %c0_22, %c1_23, %c0_24, %c0_25, %c0_26, %c0_27] : memref<1x4x2x8x2x8x128xbf16, #tpu.memory_space<vmem>>, vector<1x4x1x8x1x8x128xbf16>
    %25 = vector.shape_cast %24 : vector<1x4x1x8x1x8x128xbf16> to vector<4x8x8x128xbf16>
    %26 = vector.shape_cast %23 : vector<4x8x8x128xbf16> to vector<1x4x1x8x1x8x128xbf16>
    tpu.vector_store %arg6[%c0_21, %c0_22, %c1_23, %c0_24, %c0_25, %c0_26, %c0_27], %26 {strides = array<i32>} : memref<1x4x2x8x2x8x128xbf16, #tpu.memory_space<vmem>>, vector<1x4x1x8x1x8x128xbf16>,
    %27 = vector.extract_strided_slice %8 {offsets = [0, 384], sizes = [256, 128], strides = [1, 1]} : vector<256x512xf32> to vector<256x128xf32>
    %28 = vector.shape_cast %27 : vector<256x128xf32> to vector<4x8x8x128xf32>
    %29 = arith.truncf %28 : vector<4x8x8x128xf32> to vector<4x8x8x128xbf16>
    %c0_28 = arith.constant 0 : index
    %c0_29 = arith.constant 0 : index
    %c1_30 = arith.constant 1 : index
    %c0_31 = arith.constant 0 : index
    %c1_32 = arith.constant 1 : index
    %c0_33 = arith.constant 0 : index
    %c0_34 = arith.constant 0 : index
    %30 = vector.load %arg6[%c0_28, %c0_29, %c1_30, %c0_31, %c1_32, %c0_33, %c0_34] : memref<1x4x2x8x2x8x128xbf16, #tpu.memory_space<vmem>>, vector<1x4x1x8x1x8x128xbf16>
    %31 = vector.shape_cast %30 : vector<1x4x1x8x1x8x128xbf16> to vector<4x8x8x128xbf16>
    %32 = vector.shape_cast %29 : vector<4x8x8x128xbf16> to vector<1x4x1x8x1x8x128xbf16>
    tpu.vector_store %arg6[%c0_28, %c0_29, %c1_30, %c0_31, %c1_32, %c0_33, %c0_34], %32 {strides = array<i32>} : memref<1x4x2x8x2x8x128xbf16, #tpu.memory_space<vmem>>, vector<1x4x1x8x1x8x128xbf16>,
    return
  }
  func.func @transform_0(%arg0: i32, %arg1: i32, %arg2: i32) -> (i32, i32, i32, i32, i32) {
    %c0_i32 = arith.constant 0 : i32
    %c0_i32_0 = arith.constant 0 : i32
    %c0_i32_1 = arith.constant 0 : i32
    return %arg0, %arg1, %arg2, %c0_i32, %c0_i32_0 : i32, i32, i32, i32, i32
  }
  func.func @transform_1(%arg0: i32, %arg1: i32, %arg2: i32) -> (i32, i32) {
    %c0_i32 = arith.constant 0 : i32
    %c0_i32_0 = arith.constant 0 : i32
    %c0_i32_1 = arith.constant 0 : i32
    return %c0_i32, %c0_i32_0 : i32, i32
  }
  func.func @transform_2(%arg0: i32, %arg1: i32, %arg2: i32) -> (i32, i32) {
    %c0_i32 = arith.constant 0 : i32
    %c0_i32_0 = arith.constant 0 : i32
    %c0_i32_1 = arith.constant 0 : i32
    return %c0_i32, %c0_i32_0 : i32, i32
  }
  func.func @transform_3(%arg0: i32, %arg1: i32, %arg2: i32) -> (i32, i32, i32, i32, i32, i32, i32) {
    %c0_i32 = arith.constant 0 : i32
    %c0_i32_0 = arith.constant 0 : i32
    %c0_i32_1 = arith.constant 0 : i32
    %c0_i32_2 = arith.constant 0 : i32
    %c0_i32_3 = arith.constant 0 : i32
    return %arg0, %arg1, %c0_i32, %arg2, %c0_i32_0, %c0_i32_1, %c0_i32_2 : i32, i32, i32, i32, i32, i32, i32
  }
}

</mosaic_0001>

<bundles_post_ra>
// kernel: tile.8
= control target key start
LH: loop header
LB: loop body
LE: loop exit
PB: predicated region body
PF: predicated region fallthrough
CT: control target
= control target key end

     0   :  { %s22_s0 = inlined_call_operand.vmem [shape: f32[64], index: 0, kind: input, shape index: {}]   ;;  %s23_s1 = inlined_call_operand.vmem [shape: f32[8,64], index: 1, kind: output, shape index: {}]  }
   0x1   :  { %v4_v0 = vld [vmem:[%s22_s0] ss:$0 sm:$0xff] }
   0x2   :  { %5 = vst [vmem:[%s23_s1] sm:$0xff] %v4_v0 }

// kernel: tile.9
= control target key start
LH: loop header
LB: loop body
LE: loop exit
PB: predicated region body
PF: predicated region fallthrough
CT: control target
= control target key end

     0   :  { %vm3_vm0 = vcmask 523264   ;;  %s41_s8 = smov 64   ;;  %vm9_vm1 = vcmask 1048064   ;;  %s70_s0 = inlined_call_operand.vmem [shape: f32[8,64], index: 0, kind: input, shape index: {}]   ;;  %s71_s1 = inlined_call_operand.vmem [shape: f32[1,512], index: 1, kind: output, shape index: {}]  }
   0x1   :  { %v36_v0 = vld [vmem:[%s70_s0 + $0x1] ss:$2 sm:$0xf]   ;;  %v2_v1 = vld [vmem:[%s70_s0] ss:$2 sm:$0xf]  }
   0x2   :  { %7 = vrot.lane.b32.xlu0 %v36_v0, %s41_s8  ;;  %4 = vst.msk [vmem:[#allocation0] ss:$8 sm:$0xf] %vm3_vm0, %v2_v1  }
  0x74   :  { %v8_v2 = vpop.permute.xlu0 %7  }
  0x75   :  { %10 = vst.msk [vmem:[#allocation0] ss:$8 sm:$0xf] %vm9_vm1, %v8_v2  }
  0x7c   :  { %v14_v3 = vld [vmem:[#allocation0] sm:$0x1]  ;;  %v18_v4 = vld [vmem:[#allocation0 + $0x8] sm:$0x1]  ;;  %v23_v5 = vld [vmem:[#allocation0 + $0x10] sm:$0x1] }
  0x7d   :  { %16 = vst [vmem:[%s71_s1] sm:$0x1] %v14_v3  ;;  %37 = vst [vmem:[%s71_s1 + $0x1] sm:$0x1] %v18_v4  ;;  %v29_v6 = vld [vmem:[#allocation0 + $0x18] sm:$0x1] }
  0x7e   :  { %38 = vst [vmem:[%s71_s1 + $0x2] sm:$0x1] %v23_v5  ;;  %39 = vst [vmem:[%s71_s1 + $0x3] sm:$0x1] %v29_v6 }

// kernel: upsample_forward.1
= control target key start
LH: loop header
LB: loop body
LE: loop exit
PB: predicated region body
PF: predicated region fallthrough
CT: control target
= control target key end

     0   :  { %s1484_s12 = smov 0   ;;  %s1486_s13 = smov 0   ;;  %s1936_s0 = inlined_call_operand.vmem [shape: f32[2,4,8,8,64], index: 0, kind: input, shape index: {}]   ;;  %s1937_s1 = inlined_call_operand.vmem [shape: bf16[64,512], index: 1, kind: input, shape index: {}]   ;;  %s1938_s2 = inlined_call_operand.vmem [shape: f32[1,512], index: 2, kind: input, shape index: {}]   ;;  %s1939_s3 = inlined_call_operand.vmem [shape: bf16[2,4,2,8,2,8,128], index: 3, kind: output, shape index: {}]  }
   0x1   :  { %s1488_s14 = smov 0  }
   0x2 LB: > { %s32_s15 = sadd.s32 1, %s1457_s13  ;;  %p1237_p0 = scmp.ge.s32.totalorder %s1461_s14, 1  ;;  %s1461_s14 = sphi %s1488_s14, %s13_s14   ;;  %s1457_s13 = sphi %s1486_s13, %s1941_s13   ;;  %s1453_s12 = sphi %s1484_s12, %s1940_s12  }
   0x3   : > { %p34_p1 = scmp.ge.s32.totalorder %s32_s15, 2  ;;  %p175_p2 = scmp.lt.s32.totalorder %s1461_s14, 3 }
   0x5   : > { %s1943_s15 = smov (%p34_p1, %s32_s15), 0  ;;  %p176_p3 = pnand %p1237_p0, %p175_p2 }
   0x6   : > { %v1415_v0 = vld [vmem:[%s1937_s1 + $0x4] ss:$16 sps:$4 sm:$0xff] (!%p176_p3)   ;;  %p220_p4 = scmp.lt.s32.totalorder (!%p176_p3), %s1453_s12, 1  ;;  %v1417_v1 = vld [vmem:[%s1937_s1 + $0xc] ss:$16 sps:$4 sm:$0xff] (!%p176_p3)   ;;  %v1463_v2 = vmov (!%p176_p3), 0  }
   0x7   : > { %179 = sbr.rel (%p176_p3) target bundleno = 364 (0x16c), region = 32  ;;  %499 = vmatprep.mubr.bf16.mxu0 (!%p176_p3), %v1463_v2  ;;  %692 = vmatprep.mubr.bf16.mxu1 (!%p176_p3), %v1463_v2  ;;  %v1419_v3 = vld [vmem:[%s1937_s1] ss:$16 sps:$4 sm:$0xff] (!%p176_p3)   ;;  %v1420_v4 = vld [vmem:[%s1937_s1 + $0x8] ss:$16 sps:$4 sm:$0xff] (!%p176_p3)   ;;  %vm418_vm0 = vcmask (!%p176_p3), 523264  }
   0x8   : > { %467 = vmatprep.subr.bf16.mxu0 (!%p176_p3), %v1415_v0  ;;  %660 = vmatprep.subr.bf16.mxu1 (!%p176_p3), %v1417_v1  ;;  %v1421_v5 = vld [vmem:[%s1937_s1 + $0x24] ss:$16 sps:$4 sm:$0xff] (!%p176_p3)   ;;  %v1423_v6 = vld [vmem:[%s1937_s1 + $0x2c] ss:$16 sps:$4 sm:$0xff] (!%p176_p3)   ;;  %v1425_v7 = vld [vmem:[%s1937_s1 + $0x20] ss:$16 sps:$4 sm:$0xff] (!%p176_p3)   ;;  %v318_v1 = vlaneseq (!%p176_p3) }
   0x9   : > { %468 = vmatpush1.bf16.msra.mxu0 (!%p176_p3), %v1419_v3  ;;  %661 = vmatpush1.bf16.msra.mxu1 (!%p176_p3), %v1420_v4  ;;  %v1426_v8 = vld [vmem:[%s1937_s1 + $0x28] ss:$16 sps:$4 sm:$0xff] (!%p176_p3)   ;;  %v1427_v9 = vld [vmem:[%s1937_s1 + $0x44] ss:$16 sps:$4 sm:$0xff] (!%p176_p3)   ;;  %v1429_v10 = vld [vmem:[%s1937_s1 + $0x4c] ss:$16 sps:$4 sm:$0xff] (!%p176_p3)  }
   0xa   : > { %469 = vmatprep.subr.bf16.mxu0 (!%p176_p3), %v1421_v5  ;;  %662 = vmatprep.subr.bf16.mxu1 (!%p176_p3), %v1423_v6  ;;  %v1431_v11 = vld [vmem:[%s1937_s1 + $0x40] ss:$16 sps:$4 sm:$0xff] (!%p176_p3)   ;;  %v1432_v12 = vld [vmem:[%s1937_s1 + $0x48] ss:$16 sps:$4 sm:$0xff] (!%p176_p3)   ;;  %v1433_v13 = vld [vmem:[%s1937_s1 + $0x64] ss:$16 sps:$4 sm:$0xff] (!%p176_p3)  }
   0xb   : > { %v1435_v14 = vld [vmem:[%s1937_s1 + $0x6c] ss:$16 sps:$4 sm:$0xff] (!%p176_p3)   ;;  %v1437_v15 = vld [vmem:[%s1937_s1 + $0x60] ss:$16 sps:$4 sm:$0xff] (!%p176_p3)   ;;  %v1438_v16 = vld [vmem:[%s1937_s1 + $0x68] ss:$16 sps:$4 sm:$0xff] (!%p176_p3)  }
   0xc   : > { %v319_v3 = vshrl.u32 (!%p176_p3), %v318_v1, 7  ;;  %v316_v6 = vld [vmem:[%s1938_s2] sm:$0xf] (!%p176_p3) }
   0xd   : > { %470 = vmatpush1.bf16.msra.mxu0 (!%p176_p3), %v1425_v7  ;;  %663 = vmatpush1.bf16.msra.mxu1 (!%p176_p3), %v1426_v8 }
   0xe   : > { %s1945_s12 = smov (!%p220_p4, %s1453_s12), 1  ;;  %471 = vmatprep.subr.bf16.mxu0 %v1427_v9  ;;  %664 = vmatprep.subr.bf16.mxu1 %v1429_v10  ;;  %v320_v4 = vsub.s32 0, %v319_v3  ;;  %v328_v5 = vsub.s32 2, %v319_v3  ;;  %v324_v7 = vsub.s32 1, %v319_v3  ;;  %v332_v8 = vsub.s32 3, %v319_v3 }
   0xf   : > { %s1388_s7 = sshll.u32 %s1945_s12, 8  ;;  %s1389_s4 = sshll.u32 %s1945_s12, 9 }
  0x10   : > { %s1552_s24 = scalar_lea.vmem %s1936_s0, %s1388_s7  ;;  %v1657_v9 = vrot.slane %v316_v6, %v320_v4  ;;  %v1661_v10 = vrot.slane %v316_v6, %v324_v7  ;;  %s1671_s7 = scalar_lea.vmem %s1939_s3, %s1389_s4 }
  0x11   : > { %472 = vmatpush1.bf16.msra.mxu0 %v1431_v11  ;;  %665 = vmatpush1.bf16.msra.mxu1 %v1432_v12  ;;  %v252_v17 = vld [vmem:[%s1552_s24] sm:$0xff]  ;;  %v253_v18 = vld [vmem:[%s1552_s24 + $0x8] sm:$0xff]  ;;  %v254_v20 = vld [vmem:[%s1552_s24 + $0x10] sm:$0xff]  ;;  %v1663_v11 = vrot.slane %v316_v6, %v332_v8 }
  0x12   : > { %473 = vmatprep.subr.bf16.mxu0 %v1433_v13  ;;  %666 = vmatprep.subr.bf16.mxu1 %v1435_v14  ;;  %v284_v19 = vpack.c.bf16 %v253_v18, %v252_v17  ;;  %v255_v21 = vld [vmem:[%s1552_s24 + $0x18] sm:$0xff]  ;;  %v256_v23 = vld [vmem:[%s1552_s24 + $0x20] sm:$0xff]  ;;  %v257_v24 = vld [vmem:[%s1552_s24 + $0x28] sm:$0xff] }
  0x13   : > { %v285_v22 = vpack.c.bf16 %v255_v21, %v254_v20  ;;  %v286_v25 = vpack.c.bf16 %v257_v24, %v256_v23  ;;  %v258_v26 = vld [vmem:[%s1552_s24 + $0x30] sm:$0xff]  ;;  %v259_v27 = vld [vmem:[%s1552_s24 + $0x38] sm:$0xff]  ;;  %v260_v29 = vld [vmem:[%s1552_s24 + $0x40] sm:$0xff] }
  0x14   : > { %v287_v28 = vpack.c.bf16 %v259_v27, %v258_v26  ;;  %v261_v30 = vld [vmem:[%s1552_s24 + $0x48] sm:$0xff]  ;;  %v262_v32 = vld [vmem:[%s1552_s24 + $0x50] sm:$0xff]  ;;  %v263_v33 = vld [vmem:[%s1552_s24 + $0x58] sm:$0xff] }
  0x15   : > { %474 = vmatpush1.bf16.msra.mxu0 %v1437_v15  ;;  %667 = vmatpush1.bf16.msra.mxu1 %v1438_v16  ;;  %v288_v31 = vpack.c.bf16 %v261_v30, %v260_v29  ;;  %v289_v34 = vpack.c.bf16 %v263_v33, %v262_v32  ;;  %v264_v35 = vld [vmem:[%s1552_s24 + $0x60] sm:$0xff]  ;;  %v265_v36 = vld [vmem:[%s1552_s24 + $0x68] sm:$0xff]  ;;  %v266_v38 = vld [vmem:[%s1552_s24 + $0x70] sm:$0xff] }
  0x16   : > { %v290_v37 = vpack.c.bf16 %v265_v36, %v264_v35  ;;  %v267_v39 = vld [vmem:[%s1552_s24 + $0x78] sm:$0xff]  ;;  %v268_v41 = vld [vmem:[%s1552_s24 + $0x80] sm:$0xff]  ;;  %v269_v42 = vld [vmem:[%s1552_s24 + $0x88] sm:$0xff] }
  0x17   : > { %v291_v40 = vpack.c.bf16 %v267_v39, %v266_v38  ;;  %v292_v43 = vpack.c.bf16 %v269_v42, %v268_v41  ;;  %v270_v44 = vld [vmem:[%s1552_s24 + $0x90] sm:$0xff]  ;;  %v271_v45 = vld [vmem:[%s1552_s24 + $0x98] sm:$0xff]  ;;  %v272_v47 = vld [vmem:[%s1552_s24 + $0xa0] sm:$0xff] }
  0x18   : > { %1258 = vmatmul.mubr.msk.bf16.vlgmr.msra.gmra.mrb[0].mxu0 %vm418_vm0, %v284_v19  ;;  %1274 = vmatmul.mubr.msk.bf16.vlgmr.msra.gmra.mrb[0].mxu1 %vm418_vm0, %v284_v19  ;;  %v293_v46 = vpack.c.bf16 %v271_v45, %v270_v44  ;;  %v273_v48 = vld [vmem:[%s1552_s24 + $0xa8] sm:$0xff]  ;;  %v274_v50 = vld [vmem:[%s1552_s24 + $0xb0] sm:$0xff]  ;;  %v275_v51 = vld [vmem:[%s1552_s24 + $0xb8] sm:$0xff] }
  0x19   : > { %509 = vmatprep.mubr.bf16.mxu0 %v1463_v2  ;;  %702 = vmatprep.mubr.bf16.mxu1 %v1463_v2  ;;  %v294_v49 = vpack.c.bf16 %v273_v48, %v272_v47  ;;  %v295_v52 = vpack.c.bf16 %v275_v51, %v274_v50  ;;  %v276_v53 = vld [vmem:[%s1552_s24 + $0xc0] sm:$0xff]  ;;  %v277_v54 = vld [vmem:[%s1552_s24 + $0xc8] sm:$0xff]  ;;  %v278_v56 = vld [vmem:[%s1552_s24 + $0xd0] sm:$0xff] }
  0x1a   : > { %v296_v55 = vpack.c.bf16 %v277_v54, %v276_v53  ;;  %v279_v57 = vld [vmem:[%s1552_s24 + $0xd8] sm:$0xff]  ;;  %v280_v59 = vld [vmem:[%s1552_s24 + $0xe0] sm:$0xff]  ;;  %v281_v60 = vld [vmem:[%s1552_s24 + $0xe8] sm:$0xff] }
  0x1b   : > { %v297_v58 = vpack.c.bf16 %v279_v57, %v278_v56  ;;  %v298_v61 = vpack.c.bf16 %v281_v60, %v280_v59  ;;  %v282_v62 = vld [vmem:[%s1552_s24 + $0xf0] sm:$0xff]  ;;  %v283_v63 = vld [vmem:[%s1552_s24 + $0xf8] sm:$0xff] }
  0x1c   : > { %v299_v0 = vpack.c.bf16 %v283_v63, %v282_v62 }
  0x20   : > { %1259 = vmatmul.mubr.msk.bf16.gmra.mrb[4].mxu0 %vm418_vm0, %v285_v22  ;;  %1275 = vmatmul.mubr.msk.bf16.gmra.mrb[4].mxu1 %vm418_vm0, %v285_v22 }
  0x21   : > { %519 = vmatprep.mubr.bf16.mxu0 %v1463_v2  ;;  %712 = vmatprep.mubr.bf16.mxu1 %v1463_v2 }
  0x28   : > { %1260 = vmatmul.mubr.msk.bf16.gmra.mrb[8].mxu0 %vm418_vm0, %v286_v25  ;;  %1276 = vmatmul.mubr.msk.bf16.gmra.mrb[8].mxu1 %vm418_vm0, %v286_v25 }
  0x29   : > { %529 = vmatprep.mubr.bf16.mxu0 %v1463_v2  ;;  %722 = vmatprep.mubr.bf16.mxu1 %v1463_v2 }
  0x30   : > { %1261 = vmatmul.mubr.msk.bf16.gmra.mrb[12].mxu0 %vm418_vm0, %v287_v28  ;;  %1277 = vmatmul.mubr.msk.bf16.gmra.mrb[12].mxu1 %vm418_vm0, %v287_v28 }
  0x31   : > { %539 = vmatprep.mubr.bf16.mxu0 %v1463_v2  ;;  %732 = vmatprep.mubr.bf16.mxu1 %v1463_v2 }
  0x38   : > { %1262 = vmatmul.mubr.msk.bf16.gmra.mrb[16].mxu0 %vm418_vm0, %v288_v31  ;;  %1278 = vmatmul.mubr.msk.bf16.gmra.mrb[16].mxu1 %vm418_vm0, %v288_v31 }
  0x39   : > { %549 = vmatprep.mubr.bf16.mxu0 %v1463_v2  ;;  %742 = vmatprep.mubr.bf16.mxu1 %v1463_v2 }
  0x40   : > { %1263 = vmatmul.mubr.msk.bf16.gmra.mrb[20].mxu0 %vm418_vm0, %v289_v34  ;;  %1279 = vmatmul.mubr.msk.bf16.gmra.mrb[20].mxu1 %vm418_vm0, %v289_v34 }
  0x41   : > { %559 = vmatprep.mubr.bf16.mxu0 %v1463_v2  ;;  %752 = vmatprep.mubr.bf16.mxu1 %v1463_v2 }
  0x48   : > { %1264 = vmatmul.mubr.msk.bf16.gmra.mrb[24].mxu0 %vm418_vm0, %v290_v37  ;;  %1280 = vmatmul.mubr.msk.bf16.gmra.mrb[24].mxu1 %vm418_vm0, %v290_v37 }
  0x49   : > { %569 = vmatprep.mubr.bf16.mxu0 %v1463_v2  ;;  %762 = vmatprep.mubr.bf16.mxu1 %v1463_v2 }
  0x50   : > { %1265 = vmatmul.mubr.msk.bf16.gmra.mrb[28].mxu0 %vm418_vm0, %v291_v40  ;;  %1281 = vmatmul.mubr.msk.bf16.gmra.mrb[28].mxu1 %vm418_vm0, %v291_v40 }
  0x51   : > { %579 = vmatprep.mubr.bf16.mxu0 %v1463_v2  ;;  %772 = vmatprep.mubr.bf16.mxu1 %v1463_v2 }
  0x58   : > { %1266 = vmatmul.mubr.msk.bf16.gmra.mrb[32].mxu0 %vm418_vm0, %v292_v43  ;;  %1282 = vmatmul.mubr.msk.bf16.gmra.mrb[32].mxu1 %vm418_vm0, %v292_v43 }
  0x59   : > { %589 = vmatprep.mubr.bf16.mxu0 %v1463_v2  ;;  %782 = vmatprep.mubr.bf16.mxu1 %v1463_v2 }
  0x60   : > { %1267 = vmatmul.mubr.msk.bf16.gmra.mrb[36].mxu0 %vm418_vm0, %v293_v46  ;;  %1283 = vmatmul.mubr.msk.bf16.gmra.mrb[36].mxu1 %vm418_vm0, %v293_v46 }
  0x61   : > { %599 = vmatprep.mubr.bf16.mxu0 %v1463_v2  ;;  %792 = vmatprep.mubr.bf16.mxu1 %v1463_v2 }
  0x68   : > { %1268 = vmatmul.mubr.msk.bf16.gmra.mrb[40].mxu0 %vm418_vm0, %v294_v49  ;;  %1284 = vmatmul.mubr.msk.bf16.gmra.mrb[40].mxu1 %vm418_vm0, %v294_v49 }
  0x69   : > { %609 = vmatprep.mubr.bf16.mxu0 %v1463_v2  ;;  %802 = vmatprep.mubr.bf16.mxu1 %v1463_v2 }
  0x70   : > { %1269 = vmatmul.mubr.msk.bf16.gmra.mrb[44].mxu0 %vm418_vm0, %v295_v52  ;;  %1285 = vmatmul.mubr.msk.bf16.gmra.mrb[44].mxu1 %vm418_vm0, %v295_v52 }
  0x71   : > { %619 = vmatprep.mubr.bf16.mxu0 %v1463_v2  ;;  %812 = vmatprep.mubr.bf16.mxu1 %v1463_v2 }
  0x78   : > { %1270 = vmatmul.mubr.msk.bf16.gmra.mrb[48].mxu0 %vm418_vm0, %v296_v55  ;;  %1286 = vmatmul.mubr.msk.bf16.gmra.mrb[48].mxu1 %vm418_vm0, %v296_v55 }
  0x79   : > { %629 = vmatprep.mubr.bf16.mxu0 %v1463_v2  ;;  %822 = vmatprep.mubr.bf16.mxu1 %v1463_v2 }
  0x80   : > { %1271 = vmatmul.mubr.msk.bf16.gmra.mrb[52].mxu0 %vm418_vm0, %v297_v58  ;;  %1287 = vmatmul.mubr.msk.bf16.gmra.mrb[52].mxu1 %vm418_vm0, %v297_v58 }
  0x81   : > { %639 = vmatprep.mubr.bf16.mxu0 %v1463_v2  ;;  %832 = vmatprep.mubr.bf16.mxu1 %v1463_v2 }
  0x88   : > { %1272 = vmatmul.mubr.msk.bf16.gmra.mrb[56].mxu0 %vm418_vm0, %v298_v61  ;;  %1288 = vmatmul.mubr.msk.bf16.gmra.mrb[56].mxu1 %vm418_vm0, %v298_v61 }
  0x89   : > { %649 = vmatprep.mubr.bf16.mxu0 %v1463_v2  ;;  %842 = vmatprep.mubr.bf16.mxu1 %v1463_v2  ;;  %v1659_v2 = vrot.slane %v316_v6, %v328_v5 }
  0x90   : > { %1273 = vmatmul.mubr.msk.bf16.gmra.mrb[60].mxu0 %vm418_vm0, %v299_v0  ;;  %1289 = vmatmul.mubr.msk.bf16.gmra.mrb[60].mxu1 %vm418_vm0, %v299_v0 }
  0xeb   : > { %v501_v12 = vpop.f32.mrb[0].mxu0  ;;  %v694_v13 = vpop.f32.mrb[0].mxu1 }
  0xec   : > { %v502_v14 = vadd.f32 %v501_v12, %v1657_v9  ;;  %v695_v15 = vadd.f32 %v694_v13, %v1659_v2  ;;  %v503_v16 = vpop.f32.mrb[1].mxu0  ;;  %v696_v17 = vpop.f32.mrb[1].mxu1 }
  0xed   : > { %v504_v18 = vadd.f32 %v503_v16, %v1661_v10  ;;  %v697_v19 = vadd.f32 %v696_v17, %v1663_v11  ;;  %v505_v20 = vpop.f32.mrb[2].mxu0  ;;  %v698_v21 = vpop.f32.mrb[2].mxu1 }
  0xee   : > { %v853_v22 = vpack.c.bf16 %v502_v14, %v502_v14  ;;  %v982_v23 = vpack.c.bf16 %v695_v15, %v695_v15  ;;  %v506_v24 = vadd.f32 %v505_v20, %v1657_v9  ;;  %v699_v25 = vadd.f32 %v698_v21, %v1659_v2  ;;  %v507_v26 = vpop.f32.mrb[3].mxu0  ;;  %v700_v27 = vpop.f32.mrb[3].mxu1 }
  0xef   : > { %v917_v28 = vpack.c.bf16 %v504_v18, %v504_v18  ;;  %v1047_v29 = vpack.c.bf16 %v697_v19, %v697_v19  ;;  %v508_v30 = vadd.f32 %v507_v26, %v1661_v10  ;;  %v701_v31 = vadd.f32 %v700_v27, %v1663_v11 }
  0xf0   : > { %885 = vst [vmem:[%s1671_s7] sm:$0xf] %v853_v22  ;;  %1322 = vst [vmem:[%s1671_s7 + $0x40] sm:$0xf] %v982_v23  ;;  %v854_v32 = vpack.c.bf16 %v506_v24, %v506_v24  ;;  %v983_v33 = vpack.c.bf16 %v699_v25, %v699_v25 }
  0xf1   : > { %1290 = vst [vmem:[%s1671_s7 + $0x4] sm:$0xf] %v917_v28  ;;  %1354 = vst [vmem:[%s1671_s7 + $0x44] sm:$0xf] %v1047_v29  ;;  %v918_v34 = vpack.c.bf16 %v508_v30, %v508_v30  ;;  %v1048_v35 = vpack.c.bf16 %v701_v31, %v701_v31 }
  0xf2   : > { %886 = vst [vmem:[%s1671_s7 + $0x8] sm:$0xf] %v854_v32  ;;  %1323 = vst [vmem:[%s1671_s7 + $0x48] sm:$0xf] %v983_v33 }
  0xf3   : > { %1291 = vst [vmem:[%s1671_s7 + $0xc] sm:$0xf] %v918_v34  ;;  %1355 = vst [vmem:[%s1671_s7 + $0x4c] sm:$0xf] %v1048_v35  ;;  %v511_v36 = vpop.f32.mrb[4].mxu0  ;;  %v704_v37 = vpop.f32.mrb[4].mxu1 }
  0xf4   : > { %v512_v38 = vadd.f32 %v511_v36, %v1657_v9  ;;  %v705_v39 = vadd.f32 %v704_v37, %v1659_v2  ;;  %v513_v40 = vpop.f32.mrb[5].mxu0  ;;  %v706_v41 = vpop.f32.mrb[5].mxu1 }
  0xf5   : > { %v514_v42 = vadd.f32 %v513_v40, %v1661_v10  ;;  %v707_v43 = vadd.f32 %v706_v41, %v1663_v11  ;;  %v515_v44 = vpop.f32.mrb[6].mxu0  ;;  %v708_v45 = vpop.f32.mrb[6].mxu1 }
  0xf6   : > { %v855_v46 = vpack.c.bf16 %v512_v38, %v512_v38  ;;  %v984_v47 = vpack.c.bf16 %v705_v39, %v705_v39  ;;  %v516_v48 = vadd.f32 %v515_v44, %v1657_v9  ;;  %v709_v49 = vadd.f32 %v708_v45, %v1659_v2  ;;  %v517_v50 = vpop.f32.mrb[7].mxu0  ;;  %v710_v51 = vpop.f32.mrb[7].mxu1 }
  0xf7   : > { %v919_v52 = vpack.c.bf16 %v514_v42, %v514_v42  ;;  %v1049_v53 = vpack.c.bf16 %v707_v43, %v707_v43  ;;  %v518_v54 = vadd.f32 %v517_v50, %v1661_v10  ;;  %v711_v55 = vadd.f32 %v710_v51, %v1663_v11 }
  0xf8   : > { %887 = vst [vmem:[%s1671_s7 + $0x10] sm:$0xf] %v855_v46  ;;  %1324 = vst [vmem:[%s1671_s7 + $0x50] sm:$0xf] %v984_v47  ;;  %v856_v56 = vpack.c.bf16 %v516_v48, %v516_v48  ;;  %v985_v57 = vpack.c.bf16 %v709_v49, %v709_v49 }
  0xf9   : > { %1292 = vst [vmem:[%s1671_s7 + $0x14] sm:$0xf] %v919_v52  ;;  %1356 = vst [vmem:[%s1671_s7 + $0x54] sm:$0xf] %v1049_v53  ;;  %v920_v58 = vpack.c.bf16 %v518_v54, %v518_v54  ;;  %v1050_v59 = vpack.c.bf16 %v711_v55, %v711_v55 }
  0xfa   : > { %888 = vst [vmem:[%s1671_s7 + $0x18] sm:$0xf] %v856_v56  ;;  %1325 = vst [vmem:[%s1671_s7 + $0x58] sm:$0xf] %v985_v57 }
  0xfb   : > { %1293 = vst [vmem:[%s1671_s7 + $0x1c] sm:$0xf] %v920_v58  ;;  %1357 = vst [vmem:[%s1671_s7 + $0x5c] sm:$0xf] %v1050_v59  ;;  %v521_v60 = vpop.f32.mrb[8].mxu0  ;;  %v714_v61 = vpop.f32.mrb[8].mxu1 }
  0xfc   : > { %v522_v62 = vadd.f32 %v521_v60, %v1657_v9  ;;  %v715_v63 = vadd.f32 %v714_v61, %v1659_v2  ;;  %v523_v0 = vpop.f32.mrb[9].mxu0  ;;  %v716_v1 = vpop.f32.mrb[9].mxu1 }
  0xfd   : > { %v524_v3 = vadd.f32 %v523_v0, %v1661_v10  ;;  %v717_v4 = vadd.f32 %v716_v1, %v1663_v11  ;;  %v525_v5 = vpop.f32.mrb[10].mxu0  ;;  %v718_v6 = vpop.f32.mrb[10].mxu1 }
  0xfe   : > { %v857_v7 = vpack.c.bf16 %v522_v62, %v522_v62  ;;  %v986_v8 = vpack.c.bf16 %v715_v63, %v715_v63  ;;  %v526_v12 = vadd.f32 %v525_v5, %v1657_v9  ;;  %v719_v13 = vadd.f32 %v718_v6, %v1659_v2  ;;  %v527_v14 = vpop.f32.mrb[11].mxu0  ;;  %v720_v15 = vpop.f32.mrb[11].mxu1 }
  0xff   : > { %v921_v16 = vpack.c.bf16 %v524_v3, %v524_v3  ;;  %v1051_v17 = vpack.c.bf16 %v717_v4, %v717_v4  ;;  %v528_v18 = vadd.f32 %v527_v14, %v1661_v10  ;;  %v721_v19 = vadd.f32 %v720_v15, %v1663_v11 }
 0x100   : > { %889 = vst [vmem:[%s1671_s7 + $0x20] sm:$0xf] %v857_v7  ;;  %1326 = vst [vmem:[%s1671_s7 + $0x60] sm:$0xf] %v986_v8  ;;  %v858_v20 = vpack.c.bf16 %v526_v12, %v526_v12  ;;  %v987_v21 = vpack.c.bf16 %v719_v13, %v719_v13 }
 0x101   : > { %1294 = vst [vmem:[%s1671_s7 + $0x24] sm:$0xf] %v921_v16  ;;  %1358 = vst [vmem:[%s1671_s7 + $0x64] sm:$0xf] %v1051_v17  ;;  %v922_v22 = vpack.c.bf16 %v528_v18, %v528_v18  ;;  %v1052_v23 = vpack.c.bf16 %v721_v19, %v721_v19 }
 0x102   : > { %890 = vst [vmem:[%s1671_s7 + $0x28] sm:$0xf] %v858_v20  ;;  %1327 = vst [vmem:[%s1671_s7 + $0x68] sm:$0xf] %v987_v21 }
 0x103   : > { %1295 = vst [vmem:[%s1671_s7 + $0x2c] sm:$0xf] %v922_v22  ;;  %1359 = vst [vmem:[%s1671_s7 + $0x6c] sm:$0xf] %v1052_v23  ;;  %v531_v24 = vpop.f32.mrb[12].mxu0  ;;  %v724_v25 = vpop.f32.mrb[12].mxu1 }
 0x104   : > { %v532_v26 = vadd.f32 %v531_v24, %v1657_v9  ;;  %v725_v27 = vadd.f32 %v724_v25, %v1659_v2  ;;  %v533_v28 = vpop.f32.mrb[13].mxu0  ;;  %v726_v29 = vpop.f32.mrb[13].mxu1 }
 0x105   : > { %v534_v30 = vadd.f32 %v533_v28, %v1661_v10  ;;  %v727_v31 = vadd.f32 %v726_v29, %v1663_v11  ;;  %v535_v32 = vpop.f32.mrb[14].mxu0  ;;  %v728_v33 = vpop.f32.mrb[14].mxu1 }
 0x106   : > { %v859_v34 = vpack.c.bf16 %v532_v26, %v532_v26  ;;  %v988_v35 = vpack.c.bf16 %v725_v27, %v725_v27  ;;  %v536_v36 = vadd.f32 %v535_v32, %v1657_v9  ;;  %v729_v37 = vadd.f32 %v728_v33, %v1659_v2  ;;  %v537_v38 = vpop.f32.mrb[15].mxu0  ;;  %v730_v39 = vpop.f32.mrb[15].mxu1 }
 0x107   : > { %v923_v40 = vpack.c.bf16 %v534_v30, %v534_v30  ;;  %v1053_v41 = vpack.c.bf16 %v727_v31, %v727_v31  ;;  %v538_v42 = vadd.f32 %v537_v38, %v1661_v10  ;;  %v731_v43 = vadd.f32 %v730_v39, %v1663_v11 }
 0x108   : > { %891 = vst [vmem:[%s1671_s7 + $0x30] sm:$0xf] %v859_v34  ;;  %1328 = vst [vmem:[%s1671_s7 + $0x70] sm:$0xf] %v988_v35  ;;  %v860_v44 = vpack.c.bf16 %v536_v36, %v536_v36  ;;  %v989_v45 = vpack.c.bf16 %v729_v37, %v729_v37 }
 0x109   : > { %1296 = vst [vmem:[%s1671_s7 + $0x34] sm:$0xf] %v923_v40  ;;  %1360 = vst [vmem:[%s1671_s7 + $0x74] sm:$0xf] %v1053_v41  ;;  %v924_v46 = vpack.c.bf16 %v538_v42, %v538_v42  ;;  %v1054_v47 = vpack.c.bf16 %v731_v43, %v731_v43 }
 0x10a   : > { %892 = vst [vmem:[%s1671_s7 + $0x38] sm:$0xf] %v860_v44  ;;  %1329 = vst [vmem:[%s1671_s7 + $0x78] sm:$0xf] %v989_v45 }
 0x10b   : > { %1297 = vst [vmem:[%s1671_s7 + $0x3c] sm:$0xf] %v924_v46  ;;  %1361 = vst [vmem:[%s1671_s7 + $0x7c] sm:$0xf] %v1054_v47  ;;  %v541_v48 = vpop.f32.mrb[16].mxu0  ;;  %v734_v49 = vpop.f32.mrb[16].mxu1 }
 0x10c   : > { %v542_v50 = vadd.f32 %v541_v48, %v1657_v9  ;;  %v735_v51 = vadd.f32 %v734_v49, %v1659_v2  ;;  %v543_v52 = vpop.f32.mrb[17].mxu0  ;;  %v736_v53 = vpop.f32.mrb[17].mxu1 }
 0x10d   : > { %v544_v54 = vadd.f32 %v543_v52, %v1661_v10  ;;  %v737_v55 = vadd.f32 %v736_v53, %v1663_v11  ;;  %v545_v56 = vpop.f32.mrb[18].mxu0  ;;  %v738_v57 = vpop.f32.mrb[18].mxu1 }
 0x10e   : > { %v861_v58 = vpack.c.bf16 %v542_v50, %v542_v50  ;;  %v990_v59 = vpack.c.bf16 %v735_v51, %v735_v51  ;;  %v546_v60 = vadd.f32 %v545_v56, %v1657_v9  ;;  %v739_v61 = vadd.f32 %v738_v57, %v1659_v2  ;;  %v547_v62 = vpop.f32.mrb[19].mxu0  ;;  %v740_v63 = vpop.f32.mrb[19].mxu1 }
 0x10f   : > { %v925_v0 = vpack.c.bf16 %v544_v54, %v544_v54  ;;  %v1055_v1 = vpack.c.bf16 %v737_v55, %v737_v55  ;;  %v548_v3 = vadd.f32 %v547_v62, %v1661_v10  ;;  %v741_v4 = vadd.f32 %v740_v63, %v1663_v11 }
 0x110   : > { %893 = vst [vmem:[%s1671_s7 + $0x80] sm:$0xf] %v861_v58  ;;  %1330 = vst [vmem:[%s1671_s7 + $0xc0] sm:$0xf] %v990_v59  ;;  %v862_v5 = vpack.c.bf16 %v546_v60, %v546_v60  ;;  %v991_v6 = vpack.c.bf16 %v739_v61, %v739_v61 }
 0x111   : > { %1298 = vst [vmem:[%s1671_s7 + $0x84] sm:$0xf] %v925_v0  ;;  %1362 = vst [vmem:[%s1671_s7 + $0xc4] sm:$0xf] %v1055_v1  ;;  %v926_v7 = vpack.c.bf16 %v548_v3, %v548_v3  ;;  %v1056_v8 = vpack.c.bf16 %v741_v4, %v741_v4 }
 0x112   : > { %894 = vst [vmem:[%s1671_s7 + $0x88] sm:$0xf] %v862_v5  ;;  %1331 = vst [vmem:[%s1671_s7 + $0xc8] sm:$0xf] %v991_v6 }
 0x113   : > { %1299 = vst [vmem:[%s1671_s7 + $0x8c] sm:$0xf] %v926_v7  ;;  %1363 = vst [vmem:[%s1671_s7 + $0xcc] sm:$0xf] %v1056_v8  ;;  %v551_v12 = vpop.f32.mrb[20].mxu0  ;;  %v744_v13 = vpop.f32.mrb[20].mxu1 }
 0x114   : > { %v552_v14 = vadd.f32 %v551_v12, %v1657_v9  ;;  %v745_v15 = vadd.f32 %v744_v13, %v1659_v2  ;;  %v553_v16 = vpop.f32.mrb[21].mxu0  ;;  %v746_v17 = vpop.f32.mrb[21].mxu1 }
 0x115   : > { %v554_v18 = vadd.f32 %v553_v16, %v1661_v10  ;;  %v747_v19 = vadd.f32 %v746_v17, %v1663_v11  ;;  %v555_v20 = vpop.f32.mrb[22].mxu0  ;;  %v748_v21 = vpop.f32.mrb[22].mxu1 }
 0x116   : > { %v863_v22 = vpack.c.bf16 %v552_v14, %v552_v14  ;;  %v992_v23 = vpack.c.bf16 %v745_v15, %v745_v15  ;;  %v556_v24 = vadd.f32 %v555_v20, %v1657_v9  ;;  %v749_v25 = vadd.f32 %v748_v21, %v1659_v2  ;;  %v557_v26 = vpop.f32.mrb[23].mxu0  ;;  %v750_v27 = vpop.f32.mrb[23].mxu1 }
 0x117   : > { %v927_v28 = vpack.c.bf16 %v554_v18, %v554_v18  ;;  %v1057_v29 = vpack.c.bf16 %v747_v19, %v747_v19  ;;  %v558_v30 = vadd.f32 %v557_v26, %v1661_v10  ;;  %v751_v31 = vadd.f32 %v750_v27, %v1663_v11 }
 0x118   : > { %895 = vst [vmem:[%s1671_s7 + $0x90] sm:$0xf] %v863_v22  ;;  %1332 = vst [vmem:[%s1671_s7 + $0xd0] sm:$0xf] %v992_v23  ;;  %v864_v32 = vpack.c.bf16 %v556_v24, %v556_v24  ;;  %v993_v33 = vpack.c.bf16 %v749_v25, %v749_v25 }
 0x119   : > { %1300 = vst [vmem:[%s1671_s7 + $0x94] sm:$0xf] %v927_v28  ;;  %1364 = vst [vmem:[%s1671_s7 + $0xd4] sm:$0xf] %v1057_v29  ;;  %v928_v34 = vpack.c.bf16 %v558_v30, %v558_v30  ;;  %v1058_v35 = vpack.c.bf16 %v751_v31, %v751_v31 }
 0x11a   : > { %896 = vst [vmem:[%s1671_s7 + $0x98] sm:$0xf] %v864_v32  ;;  %1333 = vst [vmem:[%s1671_s7 + $0xd8] sm:$0xf] %v993_v33 }
 0x11b   : > { %1301 = vst [vmem:[%s1671_s7 + $0x9c] sm:$0xf] %v928_v34  ;;  %1365 = vst [vmem:[%s1671_s7 + $0xdc] sm:$0xf] %v1058_v35  ;;  %v561_v36 = vpop.f32.mrb[24].mxu0  ;;  %v754_v37 = vpop.f32.mrb[24].mxu1 }
 0x11c   : > { %v562_v38 = vadd.f32 %v561_v36, %v1657_v9  ;;  %v755_v39 = vadd.f32 %v754_v37, %v1659_v2  ;;  %v563_v40 = vpop.f32.mrb[25].mxu0  ;;  %v756_v41 = vpop.f32.mrb[25].mxu1 }
 0x11d   : > { %v564_v42 = vadd.f32 %v563_v40, %v1661_v10  ;;  %v757_v43 = vadd.f32 %v756_v41, %v1663_v11  ;;  %v565_v44 = vpop.f32.mrb[26].mxu0  ;;  %v758_v45 = vpop.f32.mrb[26].mxu1 }
 0x11e   : > { %v865_v46 = vpack.c.bf16 %v562_v38, %v562_v38  ;;  %v994_v47 = vpack.c.bf16 %v755_v39, %v755_v39  ;;  %v566_v48 = vadd.f32 %v565_v44, %v1657_v9  ;;  %v759_v49 = vadd.f32 %v758_v45, %v1659_v2  ;;  %v567_v50 = vpop.f32.mrb[27].mxu0  ;;  %v760_v51 = vpop.f32.mrb[27].mxu1 }
 0x11f   : > { %v929_v52 = vpack.c.bf16 %v564_v42, %v564_v42  ;;  %v1059_v53 = vpack.c.bf16 %v757_v43, %v757_v43  ;;  %v568_v54 = vadd.f32 %v567_v50, %v1661_v10  ;;  %v761_v55 = vadd.f32 %v760_v51, %v1663_v11 }
 0x120   : > { %897 = vst [vmem:[%s1671_s7 + $0xa0] sm:$0xf] %v865_v46  ;;  %1334 = vst [vmem:[%s1671_s7 + $0xe0] sm:$0xf] %v994_v47  ;;  %v866_v56 = vpack.c.bf16 %v566_v48, %v566_v48  ;;  %v995_v57 = vpack.c.bf16 %v759_v49, %v759_v49 }
 0x121   : > { %1302 = vst [vmem:[%s1671_s7 + $0xa4] sm:$0xf] %v929_v52  ;;  %1366 = vst [vmem:[%s1671_s7 + $0xe4] sm:$0xf] %v1059_v53  ;;  %v930_v58 = vpack.c.bf16 %v568_v54, %v568_v54  ;;  %v1060_v59 = vpack.c.bf16 %v761_v55, %v761_v55 }
 0x122   : > { %898 = vst [vmem:[%s1671_s7 + $0xa8] sm:$0xf] %v866_v56  ;;  %1335 = vst [vmem:[%s1671_s7 + $0xe8] sm:$0xf] %v995_v57 }
 0x123   : > { %1303 = vst [vmem:[%s1671_s7 + $0xac] sm:$0xf] %v930_v58  ;;  %1367 = vst [vmem:[%s1671_s7 + $0xec] sm:$0xf] %v1060_v59  ;;  %v571_v60 = vpop.f32.mrb[28].mxu0  ;;  %v764_v61 = vpop.f32.mrb[28].mxu1 }
 0x124   : > { %v572_v62 = vadd.f32 %v571_v60, %v1657_v9  ;;  %v765_v63 = vadd.f32 %v764_v61, %v1659_v2  ;;  %v573_v0 = vpop.f32.mrb[29].mxu0  ;;  %v766_v1 = vpop.f32.mrb[29].mxu1 }
 0x125   : > { %v574_v3 = vadd.f32 %v573_v0, %v1661_v10  ;;  %v767_v4 = vadd.f32 %v766_v1, %v1663_v11  ;;  %v575_v5 = vpop.f32.mrb[30].mxu0  ;;  %v768_v6 = vpop.f32.mrb[30].mxu1 }
 0x126   : > { %v867_v7 = vpack.c.bf16 %v572_v62, %v572_v62  ;;  %v996_v8 = vpack.c.bf16 %v765_v63, %v765_v63  ;;  %v576_v12 = vadd.f32 %v575_v5, %v1657_v9  ;;  %v769_v13 = vadd.f32 %v768_v6, %v1659_v2  ;;  %v577_v14 = vpop.f32.mrb[31].mxu0  ;;  %v770_v15 = vpop.f32.mrb[31].mxu1 }
 0x127   : > { %v931_v16 = vpack.c.bf16 %v574_v3, %v574_v3  ;;  %v1061_v17 = vpack.c.bf16 %v767_v4, %v767_v4  ;;  %v578_v18 = vadd.f32 %v577_v14, %v1661_v10  ;;  %v771_v19 = vadd.f32 %v770_v15, %v1663_v11 }
 0x128   : > { %899 = vst [vmem:[%s1671_s7 + $0xb0] sm:$0xf] %v867_v7  ;;  %1336 = vst [vmem:[%s1671_s7 + $0xf0] sm:$0xf] %v996_v8  ;;  %v868_v20 = vpack.c.bf16 %v576_v12, %v576_v12  ;;  %v997_v21 = vpack.c.bf16 %v769_v13, %v769_v13 }
 0x129   : > { %1304 = vst [vmem:[%s1671_s7 + $0xb4] sm:$0xf] %v931_v16  ;;  %1368 = vst [vmem:[%s1671_s7 + $0xf4] sm:$0xf] %v1061_v17  ;;  %v932_v22 = vpack.c.bf16 %v578_v18, %v578_v18  ;;  %v1062_v23 = vpack.c.bf16 %v771_v19, %v771_v19 }
 0x12a   : > { %900 = vst [vmem:[%s1671_s7 + $0xb8] sm:$0xf] %v868_v20  ;;  %1337 = vst [vmem:[%s1671_s7 + $0xf8] sm:$0xf] %v997_v21 }
 0x12b   : > { %1305 = vst [vmem:[%s1671_s7 + $0xbc] sm:$0xf] %v932_v22  ;;  %1369 = vst [vmem:[%s1671_s7 + $0xfc] sm:$0xf] %v1062_v23  ;;  %v581_v24 = vpop.f32.mrb[32].mxu0  ;;  %v774_v25 = vpop.f32.mrb[32].mxu1 }
 0x12c   : > { %v582_v26 = vadd.f32 %v581_v24, %v1657_v9  ;;  %v775_v27 = vadd.f32 %v774_v25, %v1659_v2  ;;  %v583_v28 = vpop.f32.mrb[33].mxu0  ;;  %v776_v29 = vpop.f32.mrb[33].mxu1 }
 0x12d   : > { %v584_v30 = vadd.f32 %v583_v28, %v1661_v10  ;;  %v777_v31 = vadd.f32 %v776_v29, %v1663_v11  ;;  %v585_v32 = vpop.f32.mrb[34].mxu0  ;;  %v778_v33 = vpop.f32.mrb[34].mxu1 }
 0x12e   : > { %v869_v34 = vpack.c.bf16 %v582_v26, %v582_v26  ;;  %v998_v35 = vpack.c.bf16 %v775_v27, %v775_v27  ;;  %v586_v36 = vadd.f32 %v585_v32, %v1657_v9  ;;  %v779_v37 = vadd.f32 %v778_v33, %v1659_v2  ;;  %v587_v38 = vpop.f32.mrb[35].mxu0  ;;  %v780_v39 = vpop.f32.mrb[35].mxu1 }
 0x12f   : > { %v933_v40 = vpack.c.bf16 %v584_v30, %v584_v30  ;;  %v1063_v41 = vpack.c.bf16 %v777_v31, %v777_v31  ;;  %v588_v42 = vadd.f32 %v587_v38, %v1661_v10  ;;  %v781_v43 = vadd.f32 %v780_v39, %v1663_v11 }
 0x130   : > { %901 = vst [vmem:[%s1671_s7 + $0x100] sm:$0xf] %v869_v34  ;;  %1338 = vst [vmem:[%s1671_s7 + $0x140] sm:$0xf] %v998_v35  ;;  %v870_v44 = vpack.c.bf16 %v586_v36, %v586_v36  ;;  %v999_v45 = vpack.c.bf16 %v779_v37, %v779_v37 }
 0x131   : > { %1306 = vst [vmem:[%s1671_s7 + $0x104] sm:$0xf] %v933_v40  ;;  %1370 = vst [vmem:[%s1671_s7 + $0x144] sm:$0xf] %v1063_v41  ;;  %v934_v46 = vpack.c.bf16 %v588_v42, %v588_v42  ;;  %v1064_v47 = vpack.c.bf16 %v781_v43, %v781_v43 }
 0x132   : > { %902 = vst [vmem:[%s1671_s7 + $0x108] sm:$0xf] %v870_v44  ;;  %1339 = vst [vmem:[%s1671_s7 + $0x148] sm:$0xf] %v999_v45 }
 0x133   : > { %1307 = vst [vmem:[%s1671_s7 + $0x10c] sm:$0xf] %v934_v46  ;;  %1371 = vst [vmem:[%s1671_s7 + $0x14c] sm:$0xf] %v1064_v47  ;;  %v591_v48 = vpop.f32.mrb[36].mxu0  ;;  %v784_v49 = vpop.f32.mrb[36].mxu1 }
 0x134   : > { %v592_v50 = vadd.f32 %v591_v48, %v1657_v9  ;;  %v785_v51 = vadd.f32 %v784_v49, %v1659_v2  ;;  %v593_v52 = vpop.f32.mrb[37].mxu0  ;;  %v786_v53 = vpop.f32.mrb[37].mxu1 }
 0x135   : > { %v594_v54 = vadd.f32 %v593_v52, %v1661_v10  ;;  %v787_v55 = vadd.f32 %v786_v53, %v1663_v11  ;;  %v595_v56 = vpop.f32.mrb[38].mxu0  ;;  %v788_v57 = vpop.f32.mrb[38].mxu1 }
 0x136   : > { %v871_v58 = vpack.c.bf16 %v592_v50, %v592_v50  ;;  %v1000_v59 = vpack.c.bf16 %v785_v51, %v785_v51  ;;  %v596_v60 = vadd.f32 %v595_v56, %v1657_v9  ;;  %v789_v61 = vadd.f32 %v788_v57, %v1659_v2  ;;  %v597_v62 = vpop.f32.mrb[39].mxu0  ;;  %v790_v63 = vpop.f32.mrb[39].mxu1 }
 0x137   : > { %v935_v0 = vpack.c.bf16 %v594_v54, %v594_v54  ;;  %v1065_v1 = vpack.c.bf16 %v787_v55, %v787_v55  ;;  %v598_v3 = vadd.f32 %v597_v62, %v1661_v10  ;;  %v791_v4 = vadd.f32 %v790_v63, %v1663_v11 }
 0x138   : > { %903 = vst [vmem:[%s1671_s7 + $0x110] sm:$0xf] %v871_v58  ;;  %1340 = vst [vmem:[%s1671_s7 + $0x150] sm:$0xf] %v1000_v59  ;;  %v872_v5 = vpack.c.bf16 %v596_v60, %v596_v60  ;;  %v1001_v6 = vpack.c.bf16 %v789_v61, %v789_v61 }
 0x139   : > { %1308 = vst [vmem:[%s1671_s7 + $0x114] sm:$0xf] %v935_v0  ;;  %1372 = vst [vmem:[%s1671_s7 + $0x154] sm:$0xf] %v1065_v1  ;;  %v936_v7 = vpack.c.bf16 %v598_v3, %v598_v3  ;;  %v1066_v8 = vpack.c.bf16 %v791_v4, %v791_v4 }
 0x13a   : > { %904 = vst [vmem:[%s1671_s7 + $0x118] sm:$0xf] %v872_v5  ;;  %1341 = vst [vmem:[%s1671_s7 + $0x158] sm:$0xf] %v1001_v6 }
 0x13b   : > { %1309 = vst [vmem:[%s1671_s7 + $0x11c] sm:$0xf] %v936_v7  ;;  %1373 = vst [vmem:[%s1671_s7 + $0x15c] sm:$0xf] %v1066_v8  ;;  %v601_v12 = vpop.f32.mrb[40].mxu0  ;;  %v794_v13 = vpop.f32.mrb[40].mxu1 }
 0x13c   : > { %v602_v14 = vadd.f32 %v601_v12, %v1657_v9  ;;  %v795_v15 = vadd.f32 %v794_v13, %v1659_v2  ;;  %v603_v16 = vpop.f32.mrb[41].mxu0  ;;  %v796_v17 = vpop.f32.mrb[41].mxu1 }
 0x13d   : > { %v604_v18 = vadd.f32 %v603_v16, %v1661_v10  ;;  %v797_v19 = vadd.f32 %v796_v17, %v1663_v11  ;;  %v605_v20 = vpop.f32.mrb[42].mxu0  ;;  %v798_v21 = vpop.f32.mrb[42].mxu1 }
 0x13e   : > { %v873_v22 = vpack.c.bf16 %v602_v14, %v602_v14  ;;  %v1002_v23 = vpack.c.bf16 %v795_v15, %v795_v15  ;;  %v606_v24 = vadd.f32 %v605_v20, %v1657_v9  ;;  %v799_v25 = vadd.f32 %v798_v21, %v1659_v2  ;;  %v607_v26 = vpop.f32.mrb[43].mxu0  ;;  %v800_v27 = vpop.f32.mrb[43].mxu1 }
 0x13f   : > { %v937_v28 = vpack.c.bf16 %v604_v18, %v604_v18  ;;  %v1067_v29 = vpack.c.bf16 %v797_v19, %v797_v19  ;;  %v608_v30 = vadd.f32 %v607_v26, %v1661_v10  ;;  %v801_v31 = vadd.f32 %v800_v27, %v1663_v11 }
 0x140   : > { %905 = vst [vmem:[%s1671_s7 + $0x120] sm:$0xf] %v873_v22  ;;  %1342 = vst [vmem:[%s1671_s7 + $0x160] sm:$0xf] %v1002_v23  ;;  %v874_v32 = vpack.c.bf16 %v606_v24, %v606_v24  ;;  %v1003_v33 = vpack.c.bf16 %v799_v25, %v799_v25 }
 0x141   : > { %1310 = vst [vmem:[%s1671_s7 + $0x124] sm:$0xf] %v937_v28  ;;  %1374 = vst [vmem:[%s1671_s7 + $0x164] sm:$0xf] %v1067_v29  ;;  %v938_v34 = vpack.c.bf16 %v608_v30, %v608_v30  ;;  %v1068_v35 = vpack.c.bf16 %v801_v31, %v801_v31 }
 0x142   : > { %906 = vst [vmem:[%s1671_s7 + $0x128] sm:$0xf] %v874_v32  ;;  %1343 = vst [vmem:[%s1671_s7 + $0x168] sm:$0xf] %v1003_v33 }
 0x143   : > { %1311 = vst [vmem:[%s1671_s7 + $0x12c] sm:$0xf] %v938_v34  ;;  %1375 = vst [vmem:[%s1671_s7 + $0x16c] sm:$0xf] %v1068_v35  ;;  %v611_v36 = vpop.f32.mrb[44].mxu0  ;;  %v804_v37 = vpop.f32.mrb[44].mxu1 }
 0x144   : > { %v612_v38 = vadd.f32 %v611_v36, %v1657_v9  ;;  %v805_v39 = vadd.f32 %v804_v37, %v1659_v2  ;;  %v613_v40 = vpop.f32.mrb[45].mxu0  ;;  %v806_v41 = vpop.f32.mrb[45].mxu1 }
 0x145   : > { %v614_v42 = vadd.f32 %v613_v40, %v1661_v10  ;;  %v807_v43 = vadd.f32 %v806_v41, %v1663_v11  ;;  %v615_v44 = vpop.f32.mrb[46].mxu0  ;;  %v808_v45 = vpop.f32.mrb[46].mxu1 }
 0x146   : > { %v875_v46 = vpack.c.bf16 %v612_v38, %v612_v38  ;;  %v1004_v47 = vpack.c.bf16 %v805_v39, %v805_v39  ;;  %v616_v48 = vadd.f32 %v615_v44, %v1657_v9  ;;  %v809_v49 = vadd.f32 %v808_v45, %v1659_v2  ;;  %v617_v50 = vpop.f32.mrb[47].mxu0  ;;  %v810_v51 = vpop.f32.mrb[47].mxu1 }
 0x147   : > { %v939_v52 = vpack.c.bf16 %v614_v42, %v614_v42  ;;  %v1069_v53 = vpack.c.bf16 %v807_v43, %v807_v43  ;;  %v618_v54 = vadd.f32 %v617_v50, %v1661_v10  ;;  %v811_v55 = vadd.f32 %v810_v51, %v1663_v11 }
 0x148   : > { %907 = vst [vmem:[%s1671_s7 + $0x130] sm:$0xf] %v875_v46  ;;  %1344 = vst [vmem:[%s1671_s7 + $0x170] sm:$0xf] %v1004_v47  ;;  %v876_v56 = vpack.c.bf16 %v616_v48, %v616_v48  ;;  %v1005_v57 = vpack.c.bf16 %v809_v49, %v809_v49 }
 0x149   : > { %1312 = vst [vmem:[%s1671_s7 + $0x134] sm:$0xf] %v939_v52  ;;  %1376 = vst [vmem:[%s1671_s7 + $0x174] sm:$0xf] %v1069_v53  ;;  %v940_v58 = vpack.c.bf16 %v618_v54, %v618_v54  ;;  %v1070_v59 = vpack.c.bf16 %v811_v55, %v811_v55 }
 0x14a   : > { %908 = vst [vmem:[%s1671_s7 + $0x138] sm:$0xf] %v876_v56  ;;  %1345 = vst [vmem:[%s1671_s7 + $0x178] sm:$0xf] %v1005_v57 }
 0x14b   : > { %1313 = vst [vmem:[%s1671_s7 + $0x13c] sm:$0xf] %v940_v58  ;;  %1377 = vst [vmem:[%s1671_s7 + $0x17c] sm:$0xf] %v1070_v59  ;;  %v621_v60 = vpop.f32.mrb[48].mxu0  ;;  %v814_v61 = vpop.f32.mrb[48].mxu1 }
 0x14c   : > { %v622_v62 = vadd.f32 %v621_v60, %v1657_v9  ;;  %v815_v63 = vadd.f32 %v814_v61, %v1659_v2  ;;  %v623_v0 = vpop.f32.mrb[49].mxu0  ;;  %v816_v1 = vpop.f32.mrb[49].mxu1 }
 0x14d   : > { %v624_v3 = vadd.f32 %v623_v0, %v1661_v10  ;;  %v817_v4 = vadd.f32 %v816_v1, %v1663_v11  ;;  %v625_v5 = vpop.f32.mrb[50].mxu0  ;;  %v818_v6 = vpop.f32.mrb[50].mxu1 }
 0x14e   : > { %v877_v7 = vpack.c.bf16 %v622_v62, %v622_v62  ;;  %v1006_v8 = vpack.c.bf16 %v815_v63, %v815_v63  ;;  %v626_v12 = vadd.f32 %v625_v5, %v1657_v9  ;;  %v819_v13 = vadd.f32 %v818_v6, %v1659_v2  ;;  %v627_v14 = vpop.f32.mrb[51].mxu0  ;;  %v820_v15 = vpop.f32.mrb[51].mxu1 }
 0x14f   : > { %v941_v16 = vpack.c.bf16 %v624_v3, %v624_v3  ;;  %v1071_v17 = vpack.c.bf16 %v817_v4, %v817_v4  ;;  %v628_v18 = vadd.f32 %v627_v14, %v1661_v10  ;;  %v821_v19 = vadd.f32 %v820_v15, %v1663_v11 }
 0x150   : > { %909 = vst [vmem:[%s1671_s7 + $0x180] sm:$0xf] %v877_v7  ;;  %1346 = vst [vmem:[%s1671_s7 + $0x1c0] sm:$0xf] %v1006_v8  ;;  %v878_v20 = vpack.c.bf16 %v626_v12, %v626_v12  ;;  %v1007_v21 = vpack.c.bf16 %v819_v13, %v819_v13 }
 0x151   : > { %1314 = vst [vmem:[%s1671_s7 + $0x184] sm:$0xf] %v941_v16  ;;  %1378 = vst [vmem:[%s1671_s7 + $0x1c4] sm:$0xf] %v1071_v17  ;;  %v942_v22 = vpack.c.bf16 %v628_v18, %v628_v18  ;;  %v1072_v23 = vpack.c.bf16 %v821_v19, %v821_v19 }
 0x152   : > { %910 = vst [vmem:[%s1671_s7 + $0x188] sm:$0xf] %v878_v20  ;;  %1347 = vst [vmem:[%s1671_s7 + $0x1c8] sm:$0xf] %v1007_v21 }
 0x153   : > { %1315 = vst [vmem:[%s1671_s7 + $0x18c] sm:$0xf] %v942_v22  ;;  %1379 = vst [vmem:[%s1671_s7 + $0x1cc] sm:$0xf] %v1072_v23  ;;  %v631_v24 = vpop.f32.mrb[52].mxu0  ;;  %v824_v25 = vpop.f32.mrb[52].mxu1 }
 0x154   : > { %v632_v26 = vadd.f32 %v631_v24, %v1657_v9  ;;  %v825_v27 = vadd.f32 %v824_v25, %v1659_v2  ;;  %v633_v28 = vpop.f32.mrb[53].mxu0  ;;  %v826_v29 = vpop.f32.mrb[53].mxu1 }
 0x155   : > { %v634_v30 = vadd.f32 %v633_v28, %v1661_v10  ;;  %v827_v31 = vadd.f32 %v826_v29, %v1663_v11  ;;  %v635_v32 = vpop.f32.mrb[54].mxu0  ;;  %v828_v33 = vpop.f32.mrb[54].mxu1 }
 0x156   : > { %v879_v34 = vpack.c.bf16 %v632_v26, %v632_v26  ;;  %v1008_v35 = vpack.c.bf16 %v825_v27, %v825_v27  ;;  %v636_v36 = vadd.f32 %v635_v32, %v1657_v9  ;;  %v829_v37 = vadd.f32 %v828_v33, %v1659_v2  ;;  %v637_v38 = vpop.f32.mrb[55].mxu0  ;;  %v830_v39 = vpop.f32.mrb[55].mxu1 }
 0x157   : > { %v943_v40 = vpack.c.bf16 %v634_v30, %v634_v30  ;;  %v1073_v41 = vpack.c.bf16 %v827_v31, %v827_v31  ;;  %v638_v42 = vadd.f32 %v637_v38, %v1661_v10  ;;  %v831_v43 = vadd.f32 %v830_v39, %v1663_v11 }
 0x158   : > { %911 = vst [vmem:[%s1671_s7 + $0x190] sm:$0xf] %v879_v34  ;;  %1348 = vst [vmem:[%s1671_s7 + $0x1d0] sm:$0xf] %v1008_v35  ;;  %v880_v44 = vpack.c.bf16 %v636_v36, %v636_v36  ;;  %v1009_v45 = vpack.c.bf16 %v829_v37, %v829_v37 }
 0x159   : > { %1316 = vst [vmem:[%s1671_s7 + $0x194] sm:$0xf] %v943_v40  ;;  %1380 = vst [vmem:[%s1671_s7 + $0x1d4] sm:$0xf] %v1073_v41  ;;  %v944_v46 = vpack.c.bf16 %v638_v42, %v638_v42  ;;  %v1074_v47 = vpack.c.bf16 %v831_v43, %v831_v43 }
 0x15a   : > { %912 = vst [vmem:[%s1671_s7 + $0x198] sm:$0xf] %v880_v44  ;;  %1349 = vst [vmem:[%s1671_s7 + $0x1d8] sm:$0xf] %v1009_v45 }
 0x15b   : > { %1317 = vst [vmem:[%s1671_s7 + $0x19c] sm:$0xf] %v944_v46  ;;  %1381 = vst [vmem:[%s1671_s7 + $0x1dc] sm:$0xf] %v1074_v47  ;;  %v641_v48 = vpop.f32.mrb[56].mxu0  ;;  %v834_v49 = vpop.f32.mrb[56].mxu1 }
 0x15c   : > { %v642_v50 = vadd.f32 %v641_v48, %v1657_v9  ;;  %v835_v51 = vadd.f32 %v834_v49, %v1659_v2  ;;  %v643_v52 = vpop.f32.mrb[57].mxu0  ;;  %v836_v53 = vpop.f32.mrb[57].mxu1 }
 0x15d   : > { %v644_v54 = vadd.f32 %v643_v52, %v1661_v10  ;;  %v837_v55 = vadd.f32 %v836_v53, %v1663_v11  ;;  %v645_v56 = vpop.f32.mrb[58].mxu0  ;;  %v838_v57 = vpop.f32.mrb[58].mxu1 }
 0x15e   : > { %v881_v58 = vpack.c.bf16 %v642_v50, %v642_v50  ;;  %v1010_v59 = vpack.c.bf16 %v835_v51, %v835_v51  ;;  %v646_v60 = vadd.f32 %v645_v56, %v1657_v9  ;;  %v839_v61 = vadd.f32 %v838_v57, %v1659_v2  ;;  %v647_v62 = vpop.f32.mrb[59].mxu0  ;;  %v840_v63 = vpop.f32.mrb[59].mxu1 }
 0x15f   : > { %v945_v0 = vpack.c.bf16 %v644_v54, %v644_v54  ;;  %v1075_v1 = vpack.c.bf16 %v837_v55, %v837_v55  ;;  %v648_v3 = vadd.f32 %v647_v62, %v1661_v10  ;;  %v841_v4 = vadd.f32 %v840_v63, %v1663_v11 }
 0x160   : > { %913 = vst [vmem:[%s1671_s7 + $0x1a0] sm:$0xf] %v881_v58  ;;  %1350 = vst [vmem:[%s1671_s7 + $0x1e0] sm:$0xf] %v1010_v59  ;;  %v882_v5 = vpack.c.bf16 %v646_v60, %v646_v60  ;;  %v1011_v6 = vpack.c.bf16 %v839_v61, %v839_v61 }
 0x161   : > { %1318 = vst [vmem:[%s1671_s7 + $0x1a4] sm:$0xf] %v945_v0  ;;  %1382 = vst [vmem:[%s1671_s7 + $0x1e4] sm:$0xf] %v1075_v1  ;;  %v946_v7 = vpack.c.bf16 %v648_v3, %v648_v3  ;;  %v1076_v8 = vpack.c.bf16 %v841_v4, %v841_v4 }
 0x162   : > { %914 = vst [vmem:[%s1671_s7 + $0x1a8] sm:$0xf] %v882_v5  ;;  %1351 = vst [vmem:[%s1671_s7 + $0x1e8] sm:$0xf] %v1011_v6 }
 0x163   : > { %1319 = vst [vmem:[%s1671_s7 + $0x1ac] sm:$0xf] %v946_v7  ;;  %1383 = vst [vmem:[%s1671_s7 + $0x1ec] sm:$0xf] %v1076_v8  ;;  %v651_v12 = vpop.f32.mrb[60].mxu0  ;;  %v844_v13 = vpop.f32.mrb[60].mxu1 }
 0x164   : > { %v652_v14 = vadd.f32 %v651_v12, %v1657_v9  ;;  %v845_v15 = vadd.f32 %v844_v13, %v1659_v2  ;;  %v653_v16 = vpop.f32.mrb[61].mxu0  ;;  %v846_v17 = vpop.f32.mrb[61].mxu1 }
 0x165   : > { %v654_v18 = vadd.f32 %v653_v16, %v1661_v10  ;;  %v847_v19 = vadd.f32 %v846_v17, %v1663_v11  ;;  %v655_v20 = vpop.f32.mrb[62].mxu0  ;;  %v848_v21 = vpop.f32.mrb[62].mxu1 }
 0x166   : > { %v883_v22 = vpack.c.bf16 %v652_v14, %v652_v14  ;;  %v1012_v23 = vpack.c.bf16 %v845_v15, %v845_v15  ;;  %v656_v24 = vadd.f32 %v655_v20, %v1657_v9  ;;  %v849_v25 = vadd.f32 %v848_v21, %v1659_v2  ;;  %v657_v26 = vpop.f32.mrb[63].mxu0  ;;  %v850_v27 = vpop.f32.mrb[63].mxu1 }
 0x167   : > { %v947_v28 = vpack.c.bf16 %v654_v18, %v654_v18  ;;  %v1077_v29 = vpack.c.bf16 %v847_v19, %v847_v19  ;;  %v658_v30 = vadd.f32 %v657_v26, %v1661_v10  ;;  %v851_v31 = vadd.f32 %v850_v27, %v1663_v11 }
 0x168   : > { %915 = vst [vmem:[%s1671_s7 + $0x1b0] sm:$0xf] %v883_v22  ;;  %1352 = vst [vmem:[%s1671_s7 + $0x1f0] sm:$0xf] %v1012_v23  ;;  %v884_v32 = vpack.c.bf16 %v656_v24, %v656_v24  ;;  %v1013_v33 = vpack.c.bf16 %v849_v25, %v849_v25 }
 0x169   : > { %1320 = vst [vmem:[%s1671_s7 + $0x1b4] sm:$0xf] %v947_v28  ;;  %1384 = vst [vmem:[%s1671_s7 + $0x1f4] sm:$0xf] %v1077_v29  ;;  %v948_v9 = vpack.c.bf16 %v658_v30, %v658_v30  ;;  %v1078_v34 = vpack.c.bf16 %v851_v31, %v851_v31 }
 0x16a   : > { %916 = vst [vmem:[%s1671_s7 + $0x1b8] sm:$0xf] %v884_v32  ;;  %1353 = vst [vmem:[%s1671_s7 + $0x1f8] sm:$0xf] %v1013_v33 }
 0x16b   : > { %1321 = vst [vmem:[%s1671_s7 + $0x1bc] sm:$0xf] %v948_v9  ;;  %1385 = vst [vmem:[%s1671_s7 + $0x1fc] sm:$0xf] %v1078_v34 }
 0x16c PF: > { %s13_s14 = sadd.s32 1, %s1461_s14   ;;  %s1940_s12 = smov %s1457_s13 }
 0x16d   : > { %p10_p5 = scmp.ge.s32.totalorder %s13_s14, 4   ;;  %s1941_s13 = smov %s1943_s15 }
 0x16f   :  { %12 = sbr.rel (!%p10_p5) target bundleno = 2 (0x2), region = 65 }

</bundles_post_ra>
